<compile_context>
chip_gen: v7x
topology: tpu7x:2x2x1
jax: 0.10.0
libtpu: 0.0.40
codegen_flags: <defaults>
</compile_context>

<pallas_src>
import jax
import jax.numpy as jnp
from jax.experimental import pallas as pl
from jax.experimental.pallas import tpu as pltpu

LANES = 128  # vreg lane width


def _pick_tile_rows():
    """Rows per tile, chosen per TPU generation (buffer = rows * 128 * 4 B)."""
    try:
        kind = jax.devices()[0].device_kind.lower()
    except Exception:
        return 2048
    if "v7" in kind or "tpu7" in kind:
        return 8192   # 4 MiB/buffer; 4 double-buffered buffers = 16 MiB < 32 MiB default
    if "v6" in kind:
        return 4096   # 2 MiB/buffer; 8 MiB total
    return 2048       # v5e & others: 1 MiB/buffer; 4 MiB total < 16 MiB default


def _logreg_kernel(x_ref, w_ref, b_ref, o_ref):
    # x_ref: (tile_rows, 128) VMEM; w_ref, b_ref: (1,) SMEM scalars.
    w = w_ref[0]
    b = b_ref[0]
    z = x_ref[...] * w + b
    # sigmoid(z) == 0.5 * tanh(0.5 * z) + 0.5 : single EUP transcendental.
    o_ref[...] = (0.5 * jnp.tanh(0.5 * z) + 0.5).astype(o_ref.dtype)


def logistic_regression_forward(x, weight, bias):
    """x: (N, 1) f32; weight: (1, 1) [PyTorch layout]; bias: (1,). Returns (N, 1)."""
    n, d_in = x.shape
    d_out, d_in_w = weight.shape
    assert d_in == 1 and d_in_w == 1 and d_out == 1, "kernel specialized to 1->1 Linear"

    x_flat = x.reshape(-1).astype(jnp.float32)

    # Lane-dense slab: pack the N-element column into rows of 128 lanes.
    if n % LANES == 0:
        # Fast path: pure bitcast reshapes, zero extra HBM traffic.
        rows = n // LANES
        x_slab = x_flat.reshape(rows, LANES)
        padded = False
    else:
        # Minimal pad (only up to the next 8x128 tile), trimmed after the call.
        rows = max(8, ((-(-n // LANES) + 7) // 8) * 8)
        x_slab = jnp.pad(x_flat, (0, rows * LANES - n)).reshape(rows, LANES)
        padded = True

    tile_rows = min(_pick_tile_rows(), ((rows + 7) // 8) * 8)
    num_tiles = pl.cdiv(rows, tile_rows)   # ragged last block is masked by Pallas

    w_s = weight.reshape(1).astype(jnp.float32)   # SMEM scalar
    b_s = bias.reshape(1).astype(jnp.float32)     # SMEM scalar

    out_slab = pl.pallas_call(
        _logreg_kernel,
        out_shape=jax.ShapeDtypeStruct((rows, LANES), jnp.float32),
        grid_spec=pltpu.PrefetchScalarGridSpec(
            num_scalar_prefetch=0,
            grid=(num_tiles,),
            in_specs=[
                pl.BlockSpec((tile_rows, LANES), lambda i: (i, 0)),
                pl.BlockSpec(memory_space=pltpu.MemorySpace.SMEM),
                pl.BlockSpec(memory_space=pltpu.MemorySpace.SMEM),
            ],
            out_specs=pl.BlockSpec((tile_rows, LANES), lambda i: (i, 0)),
        ),
        compiler_params=pltpu.CompilerParams(
            dimension_semantics=("parallel",)),
    )(x_slab, w_s, b_s)

    if padded:
        out = out_slab.reshape(-1)[:n].reshape(n, 1)   # trim the ragged tail
    else:
        out = out_slab.reshape(n, 1)                   # bitcast, no copy
    return out.astype(x.dtype)


if __name__ == "__main__":
    # --- Toy dataset identical to Data(): torch.arange(-1, 1, 0.1).view(-1, 1) ---
    x = jnp.arange(-1.0, 1.0, 0.1, dtype=jnp.float32).reshape(-1, 1)   # (20, 1)

    # Deterministic nn.Linear(1, 1)-style init: U(-1/sqrt(fan_in), 1/sqrt(fan_in))
    n_inputs, n_outputs = 1, 1
    key = jax.random.PRNGKey(0)
    kw, kb, kx1, kx2 = jax.random.split(key, 4)
    bound = 1.0 / jnp.sqrt(jnp.float32(n_inputs))
    weight = jax.random.uniform(kw, (n_outputs, n_inputs), jnp.float32, -bound, bound)
    bias = jax.random.uniform(kb, (n_outputs,), jnp.float32, -bound, bound)

    def ref_fn(xv):
        return jax.nn.sigmoid(xv @ weight.T + bias)

    # Small (toy) case — exercises the padded / ragged path.
    yhat = jax.block_until_ready(logistic_regression_forward(x, weight, bias))
    assert yhat.shape == (x.shape[0], 1)
    assert jnp.allclose(yhat, ref_fn(x), atol=1e-5), "mismatch vs reference (small)"

    # Large streaming case (N multiple of 128): zero-copy path, multiple tiles
    # (>= 4 tiles even at the v7x tile size, so both TensorCores get work).
    n_big = 1 << 22
    x_big = jax.random.normal(kx1, (n_big, 1), jnp.float32)
    yhat_big = jax.block_until_ready(logistic_regression_forward(x_big, weight, bias))
    assert yhat_big.shape == (n_big, 1)
    assert jnp.allclose(yhat_big, ref_fn(x_big), atol=1e-5), "mismatch vs reference (large)"

    # Ragged N (not a multiple of 128): exercises the minimal-pad + trim path.
    n_rag = 70_000
    x_rag = jax.random.normal(kx2, (n_rag, 1), jnp.float32)
    yhat_rag = jax.block_until_ready(logistic_regression_forward(x_rag, weight, bias))
    assert yhat_rag.shape == (n_rag, 1)
    assert jnp.allclose(yhat_rag, ref_fn(x_rag), atol=1e-5), "mismatch vs reference (ragged)"

    print("KERNEL_OK")
</pallas_src>

<mosaic_0001>
module attributes {stable_mosaic.version = 11 : i64} {
  func.func @_logreg_kernel(%arg0: i32, %arg1: memref<8x128xf32, #tpu.memory_space<vmem>>, %arg2: memref<1xf32, #tpu.memory_space<smem>>, %arg3: memref<1xf32, #tpu.memory_space<smem>>, %arg4: memref<8x128xf32, #tpu.memory_space<vmem>>) attributes {dimension_semantics = [#tpu.dimension_semantics<parallel>], iteration_bounds = array<i64: 1>, scalar_prefetch = 0 : i64, scratch_operands = 0 : i64, tpu.core_type = #tpu.core_type<tc>, window_params = [{transform_indices = @transform_0, window_bounds = array<i64: 8, 128>}, {transform_indices = @transform_1, window_bounds = array<i64: 1>}, {transform_indices = @transform_2, window_bounds = array<i64: 1>}, {transform_indices = @transform_3, window_bounds = array<i64: 8, 128>}]} {
    %c0 = arith.constant 0 : index
    %0 = memref.load %arg2[%c0] : memref<1xf32, #tpu.memory_space<smem>>
    %c0_0 = arith.constant 0 : index
    %1 = memref.load %arg3[%c0_0] : memref<1xf32, #tpu.memory_space<smem>>
    %c0_1 = arith.constant 0 : index
    %c0_2 = arith.constant 0 : index
    %2 = vector.load %arg1[%c0_1, %c0_2] : memref<8x128xf32, #tpu.memory_space<vmem>>, vector<8x128xf32>
    %3 = vector.broadcast %0 : f32 to vector<8x128xf32>
    %4 = arith.mulf %2, %3 : vector<8x128xf32>
    %5 = vector.broadcast %1 : f32 to vector<8x128xf32>
    %6 = arith.addf %4, %5 : vector<8x128xf32>
    %cst = arith.constant 5.000000e-01 : f32
    %7 = vector.broadcast %cst : f32 to vector<8x128xf32>
    %8 = arith.mulf %7, %6 : vector<8x128xf32>
    %9 = math.tanh %8 : vector<8x128xf32>
    %cst_3 = arith.constant 5.000000e-01 : f32
    %10 = vector.broadcast %cst_3 : f32 to vector<8x128xf32>
    %11 = arith.mulf %10, %9 : vector<8x128xf32>
    %cst_4 = arith.constant 5.000000e-01 : f32
    %12 = vector.broadcast %cst_4 : f32 to vector<8x128xf32>
    %13 = arith.addf %11, %12 : vector<8x128xf32>
    %c0_5 = arith.constant 0 : index
    %c0_6 = arith.constant 0 : index
    %14 = vector.load %arg4[%c0_5, %c0_6] : memref<8x128xf32, #tpu.memory_space<vmem>>, vector<8x128xf32>
    tpu.vector_store %arg4[%c0_5, %c0_6], %13 {strides = array<i32>} : memref<8x128xf32, #tpu.memory_space<vmem>>, vector<8x128xf32>,
    return
  }
  func.func @transform_0(%arg0: i32) -> (i32, i32) {
    %c0_i32 = arith.constant 0 : i32
    %c0_i32_0 = arith.constant 0 : i32
    return %arg0, %c0_i32 : i32, i32
  }
  func.func @transform_1(%arg0: i32) -> i32 {
    %c0_i32 = arith.constant 0 : i32
    %c0_i32_0 = arith.constant 0 : i32
    return %c0_i32 : i32
  }
  func.func @transform_2(%arg0: i32) -> i32 {
    %c0_i32 = arith.constant 0 : i32
    %c0_i32_0 = arith.constant 0 : i32
    return %c0_i32 : i32
  }
  func.func @transform_3(%arg0: i32) -> (i32, i32) {
    %c0_i32 = arith.constant 0 : i32
    %c0_i32_0 = arith.constant 0 : i32
    return %arg0, %c0_i32 : i32, i32
  }
}

</mosaic_0001>

<bundles_post_ra>
// kernel: tpu_custom_call.1
= control target key start
LH: loop header
LB: loop body
LE: loop exit
PB: predicated region body
PF: predicated region fallthrough
CT: control target
= control target key end

     0   :  { %10 = vsyncpa [#allocation5], 0  ;;  %s160_s0 = inlined_call_operand.hbm [shape: f32[8,128], index: 0, kind: input, shape index: {}]   ;;  %s161_s1 = inlined_call_operand.<no memory space> [shape: f32[1], index: 1, kind: input, shape index: {}]   ;;  %s162_s2 = inlined_call_operand.<no memory space> [shape: f32[1], index: 2, kind: input, shape index: {}]   ;;  %s163_s3 = inlined_call_operand.hbm [shape: f32[8,128], index: 3, kind: output, shape index: {}]  }
   0x1   :  { %11 = vsyncpa [#allocation6], 0  ;;  %s108_s12 = smov [#allocation4]   ;;  %s60_s16 = scalar_lea.hbm %s160_s0, 128 }
   0x2   :  { %s18_s13 = sshll.u32 %s108_s12, 4  ;;  %p61_p0 = scmp.ne.s32.totalorder %s160_s0, %s60_s16  ;;  %s19_s13 = int_to_ptr.vmem [resolvable:$true] %s18_s13 }
   0x3   :  { %p64_p1 = scmp.lt.u32.totalorder %s60_s16, %s160_s0 }
   0x5   :  { %p66_p2 = pnand %p64_p1, %p61_p0 }
   0x7   :  { %69 = shalt.err (!%p66_p2)
}
   0x8   :  { %s70_s21 = scalar_lea.vmem %s19_s13, 128  ;;  %p75_p4 = scmp.lt.s32.totalorder %s19_s13, %s19_s13 }
   0x9   :  { %p71_p3 = scmp.ne.s32.totalorder %s19_s13, %s70_s21  ;;  %p76_p5 = scmp.lt.s32.totalorder %s70_s21, %s70_s21 }
   0xb   :  { %p77_p6 = por %p76_p5, %p75_p4 }
   0xd   :  { %p78_p7 = pnand %p77_p6, %p71_p3 }
   0xf   :  { %81 = shalt.err (!%p78_p7)
}
  0x10   :  { %21 = dma.hbm_to_vmem [thread:$0]  %s160_s0, 128, %s19_s13, [#allocation5]  }
  0x11   :  { %104 = dma.done.wait [#allocation5], 128  }
  0x12   :  { %105 = vsyncadd [#allocation5], 4294967168  ;;  %v32_v0 = vstv %s161_s1  ;;  %v31_v1 = vld [vmem:[#allocation4] sm:$0xff]  ;;  %v34_v2 = vstv %s162_s2  ;;  %s109_s28 = smov [#allocation7]  }
  0x13   :  { %v33_v3 = vmul.f32 %v32_v0, %v31_v1  ;;  %s47_s29 = sshll.u32 %s109_s28, 4  ;;  %s48_s29 = int_to_ptr.vmem [resolvable:$true] %s47_s29 }
  0x14   :  { %s82_s0 = scalar_lea.vmem %s48_s29, 128  ;;  %p87_p9 = scmp.lt.s32.totalorder %s48_s29, %s48_s29 }
  0x15   :  { %v35_v4 = vadd.f32 %v34_v2, %v33_v3  ;;  %p83_p8 = scmp.ne.s32.totalorder %s48_s29, %s82_s0  ;;  %p88_p10 = scmp.lt.s32.totalorder %s82_s0, %s82_s0 }
  0x17   :  { %v36_v5 = vmul.f32 0.5, %v35_v4  ;;  %p89_p11 = por %p88_p10, %p87_p9 }
  0x19   :  { %58 = vtanh.f32 %v36_v5  ;;  %p90_p12 = pnand %p89_p11, %p83_p8 }
  0x23   :  { %v59_v6 = vpop.eup %58 }
  0x24   :  { %v38_v7 = vmul.f32 0.5, %v59_v6 }
  0x26   :  { %v39_v8 = vadd.f32 0.5, %v38_v7 }
  0x28   :  { %40 = vst [vmem:[#allocation7] sm:$0xff] %v39_v8 }
  0x29   :  { %93 = shalt.err (!%p90_p12)
}
  0x2a   :  { %s94_s30 = scalar_lea.hbm %s163_s3, 128 }
  0x2b   :  { %p95_p13 = scmp.ne.s32.totalorder %s163_s3, %s94_s30  ;;  %p98_p0 = scmp.lt.u32.totalorder %s94_s30, %s163_s3 }
  0x2d   :  { %p100_p1 = pnand %p98_p0, %p95_p13 }
  0x2f   :  { %103 = shalt.err (!%p100_p1)
}
  0x30   :  { %50 = dma.vmem_to_hbm [thread:$0]  %s48_s29, 128, %s163_s3, [#allocation6]  }
  0x31   :  { %106 = dma.done.wait [#allocation6], 128  }
  0x32   :  { %107 = vsyncadd [#allocation6], 4294967168 }
  0x33   :  { %54 = vsyncpa [#allocation5], 1 }
  0x34   :  { %55 = vsyncpa [#allocation6], 1 }

</bundles_post_ra>
